<compile_context>
chip_gen: v7x
topology: tpu7x:2x2x1
jax: 0.10.0
libtpu: 0.0.40
codegen_flags: <defaults>
</compile_context>

<pallas_src>
import functools

import jax
import jax.numpy as jnp
from jax.experimental import pallas as pl
from jax.experimental.pallas import tpu as pltpu


def _round_up(n, m):
    return ((n + m - 1) // m) * m


def _mlp_kernel(xt_ref, w1_ref, b1_ref, w2_ref, b2_ref, w3_ref, b3_ref, o_ref,
                *, epi_dtype):
    # Feature-major: rows = features (sublanes), columns = batch (lanes).
    xt = xt_ref[...]                                                      # (D, TB) bf16
    h1 = jnp.dot(w1_ref[...], xt, preferred_element_type=jnp.float32)     # (128, TB) f32 acc
    h1 = jnp.maximum(h1.astype(epi_dtype) + b1_ref[...], 0)               # bn1-folded bias + relu
    h1 = h1.astype(jnp.bfloat16)                                          # dropout = identity
    h2 = jnp.dot(w2_ref[...], h1, preferred_element_type=jnp.float32)     # (32, TB) f32 acc
    h2 = jnp.maximum(h2.astype(epi_dtype) + b2_ref[...], 0)
    h2 = h2.astype(jnp.bfloat16)
    # fc3: (1,32) @ (32,TB) -> (1,TB); lane-dense, full-width stores.
    o_ref[...] = (jnp.dot(w3_ref[...], h2, preferred_element_type=jnp.float32)
                  + b3_ref[...])


def house_value_predictor(x, params, *, tile_b=8192, epi_dtype=None):
    """x: (B, input_dim) float32. params: dict of BN-folded, feature-major weights/biases."""
    B, D = x.shape

    if epi_dtype is None:
        kind = jax.devices()[0].device_kind.lower()
        # bf16 VALU exists on v6e/v7x; keep the elementwise epilogue f32 on v5e and older.
        epi_dtype = jnp.bfloat16 if ("v6" in kind or "v7" in kind) else jnp.float32

    # Batch tile on the lane axis: multiple of 128, big enough to amortize ~0.35us/step grid
    # overhead, capped so there are >= 2 grid steps (v7x megacore shards the "parallel" axis).
    tile_b = _round_up(max(tile_b, 128), 128)
    tile_b = min(tile_b, _round_up(pl.cdiv(B, 2), 128))
    grid_b = pl.cdiv(B, tile_b)
    b_pad = grid_b * tile_b

    # Single wrapper pass: transpose to feature-major, fused with the bf16 cast.
    # No jnp.pad: the last (partial) block reads past B; those lanes are garbage but each
    # output column depends only on its own input column and the wrapper slices [:B].
    xt = x.T.astype(jnp.bfloat16)                                         # (D, B) bf16

    w1, w2, w3 = params["w1"], params["w2"], params["w3"]
    b1 = params["b1"].astype(epi_dtype)
    b2 = params["b2"].astype(epi_dtype)
    b3 = params["b3"]

    flops = 2 * b_pad * (D * 128 + 128 * 32 + 32 * 1)
    bytes_accessed = (D * b_pad * 2 + b_pad * 4
                      + w1.size * 2 + w2.size * 2 + w3.size * 2
                      + (b1.size + b2.size) * jnp.dtype(epi_dtype).itemsize
                      + b3.size * 4)

    const = lambda i: (0, 0)    # weights/biases: same block every step -> VMEM-resident

    out_t = pl.pallas_call(
        functools.partial(_mlp_kernel, epi_dtype=epi_dtype),
        out_shape=jax.ShapeDtypeStruct((1, b_pad), jnp.float32),
        grid=(grid_b,),
        in_specs=[
            pl.BlockSpec((D, tile_b), lambda i: (0, i)),   # x^T: batch-tiled, double-buffered
            pl.BlockSpec(w1.shape, const),
            pl.BlockSpec(b1.shape, const),
            pl.BlockSpec(w2.shape, const),
            pl.BlockSpec(b2.shape, const),
            pl.BlockSpec(w3.shape, const),
            pl.BlockSpec(b3.shape, const),
        ],
        out_specs=pl.BlockSpec((1, tile_b), lambda i: (0, i)),   # lane-dense output tile
        compiler_params=pltpu.CompilerParams(
            dimension_semantics=("parallel",),                   # megacore on v7x
            vmem_limit_bytes=32 * 1024 * 1024),                  # headroom above v5e's 16 MiB default
        cost_estimate=pl.CostEstimate(flops=flops, transcendentals=0,
                                      bytes_accessed=bytes_accessed),
    )(xt, w1, b1, w2, b2, w3, b3)

    return out_t[:, :B].T                                        # (B, 1) float32


def init_params(key, input_dim):
    """Deterministic parameter init; returns kernel-ready (BN-folded, feature-major) params."""
    ks = jax.random.split(key, 14)
    eps = 1e-5

    def linear(kw, kb, fan_in, fan_out):
        bound = 1.0 / jnp.sqrt(fan_in)
        w = jax.random.uniform(kw, (fan_out, fan_in), jnp.float32, -bound, bound)
        b = jax.random.uniform(kb, (fan_out,), jnp.float32, -bound, bound)
        return w, b

    def batchnorm(kg, kb, km, kv, n):
        gamma = 1.0 + 0.1 * jax.random.normal(kg, (n,), jnp.float32)
        beta = 0.1 * jax.random.normal(kb, (n,), jnp.float32)
        mean = 0.1 * jax.random.normal(km, (n,), jnp.float32)
        var = 1.0 + 0.1 * jax.random.uniform(kv, (n,), jnp.float32)
        return gamma, beta, mean, var

    w1, b1 = linear(ks[0], ks[1], input_dim, 128)
    w2, b2 = linear(ks[2], ks[3], 128, 32)
    w3, b3 = linear(ks[4], ks[5], 32, 1)
    g1, be1, m1, v1 = batchnorm(ks[6], ks[7], ks[8], ks[9], 128)
    g2, be2, m2, v2 = batchnorm(ks[10], ks[11], ks[12], ks[13], 32)

    # Fold BN (inference) into the preceding Linear: y = (W x + b) * s + t
    s1 = g1 / jnp.sqrt(v1 + eps)
    t1 = be1 - m1 * s1
    s2 = g2 / jnp.sqrt(v2 + eps)
    t2 = be2 - m2 * s2

    # Keep torch's (out_features, in_features) layout — exactly feature-major for W @ x^T.
    # Cast the MXU weight mats to bf16 ONCE here (hoisted out of the kernel/wrapper).
    return dict(
        w1=(w1 * s1[:, None]).astype(jnp.bfloat16),        # (128, D)  bf16
        b1=(b1 * s1 + t1)[:, None].astype(jnp.float32),    # (128, 1)  f32
        w2=(w2 * s2[:, None]).astype(jnp.bfloat16),        # (32, 128) bf16
        b2=(b2 * s2 + t2)[:, None].astype(jnp.float32),    # (32, 1)   f32
        w3=w3.astype(jnp.bfloat16),                        # (1, 32)   bf16
        b3=b3[:, None].astype(jnp.float32),                # (1, 1)    f32
    )


def _reference(x, p, epi_dtype):
    # Plain-JAX reference with identical bf16 rounding of MXU inputs / epilogue dtype.
    xt = x.T.astype(jnp.bfloat16).astype(jnp.float32)
    h1 = p["w1"].astype(jnp.float32) @ xt
    h1 = jnp.maximum(h1.astype(epi_dtype) + p["b1"].astype(epi_dtype), 0)
    h1 = h1.astype(jnp.bfloat16).astype(jnp.float32)
    h2 = p["w2"].astype(jnp.float32) @ h1
    h2 = jnp.maximum(h2.astype(epi_dtype) + p["b2"].astype(epi_dtype), 0)
    h2 = h2.astype(jnp.bfloat16).astype(jnp.float32)
    out = p["w3"].astype(jnp.float32) @ h2 + p["b3"]
    return out.T                                           # (B, 1)


if __name__ == "__main__":
    key = jax.random.PRNGKey(0)
    k_x, k_p = jax.random.split(key)

    batch = 8
    num_features = 8      # num_values.shape[1]
    cat_features = 8      # cat_values.shape[1]
    input_dim = num_features + cat_features

    x = jax.random.normal(k_x, (batch, input_dim), dtype=jnp.float32)
    params = init_params(k_p, input_dim)

    kind = jax.devices()[0].device_kind.lower()
    epi_dtype = jnp.bfloat16 if ("v6" in kind or "v7" in kind) else jnp.float32

    out = house_value_predictor(x, params, epi_dtype=epi_dtype)
    out = jax.block_until_ready(out)

    ref = _reference(x, params, epi_dtype)
    assert out.shape == (batch, 1)
    err = float(jnp.max(jnp.abs(out - ref)))
    assert jnp.allclose(out, ref, atol=2e-3, rtol=2e-3), err

    print("KERNEL_OK")
</pallas_src>

<mosaic_0001>
module attributes {stable_mosaic.version = 11 : i64} {
  func.func @_mlp_kernel(%arg0: i32, %arg1: memref<16x128xbf16, #tpu.memory_space<vmem>>, %arg2: memref<128x16xbf16, #tpu.memory_space<vmem>>, %arg3: memref<128x1xf32, #tpu.memory_space<vmem>>, %arg4: memref<32x128xbf16, #tpu.memory_space<vmem>>, %arg5: memref<32x1xf32, #tpu.memory_space<vmem>>, %arg6: memref<1x32xbf16, #tpu.memory_space<vmem>>, %arg7: memref<1x1xf32, #tpu.memory_space<vmem>>, %arg8: memref<1x128xf32, #tpu.memory_space<vmem>>) attributes {dimension_semantics = [#tpu.dimension_semantics<parallel>], iteration_bounds = array<i64: 1>, scalar_prefetch = 0 : i64, scratch_operands = 0 : i64, tpu.core_type = #tpu.core_type<tc>, window_params = [{transform_indices = @transform_0, window_bounds = array<i64: 16, 128>}, {pipeline_mode = #tpu.pipeline_mode<synchronous>, transform_indices = @transform_1, window_bounds = array<i64: 128, 16>}, {pipeline_mode = #tpu.pipeline_mode<synchronous>, transform_indices = @transform_2, window_bounds = array<i64: 128, 1>}, {pipeline_mode = #tpu.pipeline_mode<synchronous>, transform_indices = @transform_3, window_bounds = array<i64: 32, 128>}, {pipeline_mode = #tpu.pipeline_mode<synchronous>, transform_indices = @transform_4, window_bounds = array<i64: 32, 1>}, {pipeline_mode = #tpu.pipeline_mode<synchronous>, transform_indices = @transform_5, window_bounds = array<i64: 1, 32>}, {pipeline_mode = #tpu.pipeline_mode<synchronous>, transform_indices = @transform_6, window_bounds = array<i64: 1, 1>}, {transform_indices = @transform_7, window_bounds = array<i64: 1, 128>}]} {
    %c0 = arith.constant 0 : index
    %c0_0 = arith.constant 0 : index
    %0 = vector.load %arg1[%c0, %c0_0] : memref<16x128xbf16, #tpu.memory_space<vmem>>, vector<16x128xbf16>
    %c0_1 = arith.constant 0 : index
    %c0_2 = arith.constant 0 : index
    %1 = vector.load %arg2[%c0_1, %c0_2] : memref<128x16xbf16, #tpu.memory_space<vmem>>, vector<128x16xbf16>
    %cst = arith.constant dense<0.000000e+00> : vector<128x128xf32>
    %2 = tpu.matmul %1, %0, %cst {dimension_numbers = #tpu.dot_dimension_numbers<[1], [0], [0], [1], [0, 0, 1, 1], [], []>} : vector<128x16xbf16>, vector<16x128xbf16>, vector<128x128xf32> -> vector<128x128xf32>
    %c0_3 = arith.constant 0 : index
    %c0_4 = arith.constant 0 : index
    %3 = vector.load %arg3[%c0_3, %c0_4] : memref<128x1xf32, #tpu.memory_space<vmem>>, vector<128x1xf32>
    %4 = vector.broadcast %3 : vector<128x1xf32> to vector<128x128xf32>
    %5 = arith.addf %2, %4 : vector<128x128xf32>
    %cst_5 = arith.constant 0.000000e+00 : f32
    %6 = vector.broadcast %cst_5 : f32 to vector<128x128xf32>
    %7 = arith.maximumf %5, %6 : vector<128x128xf32>
    %8 = arith.truncf %7 : vector<128x128xf32> to vector<128x128xbf16>
    %c0_6 = arith.constant 0 : index
    %c0_7 = arith.constant 0 : index
    %9 = vector.load %arg4[%c0_6, %c0_7] : memref<32x128xbf16, #tpu.memory_space<vmem>>, vector<32x128xbf16>
    %cst_8 = arith.constant dense<0.000000e+00> : vector<32x128xf32>
    %10 = tpu.matmul %9, %8, %cst_8 {dimension_numbers = #tpu.dot_dimension_numbers<[1], [0], [0], [1], [0, 0, 1, 1], [], []>} : vector<32x128xbf16>, vector<128x128xbf16>, vector<32x128xf32> -> vector<32x128xf32>
    %c0_9 = arith.constant 0 : index
    %c0_10 = arith.constant 0 : index
    %11 = vector.load %arg5[%c0_9, %c0_10] : memref<32x1xf32, #tpu.memory_space<vmem>>, vector<32x1xf32>
    %12 = vector.broadcast %11 : vector<32x1xf32> to vector<32x128xf32>
    %13 = arith.addf %10, %12 : vector<32x128xf32>
    %cst_11 = arith.constant 0.000000e+00 : f32
    %14 = vector.broadcast %cst_11 : f32 to vector<32x128xf32>
    %15 = arith.maximumf %13, %14 : vector<32x128xf32>
    %16 = arith.truncf %15 : vector<32x128xf32> to vector<32x128xbf16>
    %c0_12 = arith.constant 0 : index
    %c0_13 = arith.constant 0 : index
    %17 = vector.load %arg6[%c0_12, %c0_13] : memref<1x32xbf16, #tpu.memory_space<vmem>>, vector<1x32xbf16>
    %cst_14 = arith.constant dense<0.000000e+00> : vector<1x128xf32>
    %18 = tpu.matmul %17, %16, %cst_14 {dimension_numbers = #tpu.dot_dimension_numbers<[1], [0], [0], [1], [0, 0, 1, 1], [], []>} : vector<1x32xbf16>, vector<32x128xbf16>, vector<1x128xf32> -> vector<1x128xf32>
    %c0_15 = arith.constant 0 : index
    %c0_16 = arith.constant 0 : index
    %19 = vector.load %arg7[%c0_15, %c0_16] : memref<1x1xf32, #tpu.memory_space<vmem>>, vector<1x1xf32>
    %20 = vector.broadcast %19 : vector<1x1xf32> to vector<1x128xf32>
    %21 = arith.addf %18, %20 : vector<1x128xf32>
    %c0_17 = arith.constant 0 : index
    %c0_18 = arith.constant 0 : index
    %22 = vector.load %arg8[%c0_17, %c0_18] : memref<1x128xf32, #tpu.memory_space<vmem>>, vector<1x128xf32>
    tpu.vector_store %arg8[%c0_17, %c0_18], %21 {strides = array<i32>} : memref<1x128xf32, #tpu.memory_space<vmem>>, vector<1x128xf32>,
    return
  }
  func.func @transform_0(%arg0: i32) -> (i32, i32) {
    %c0_i32 = arith.constant 0 : i32
    %c0_i32_0 = arith.constant 0 : i32
    return %c0_i32, %arg0 : i32, i32
  }
  func.func @transform_1(%arg0: i32) -> (i32, i32) {
    %c0_i32 = arith.constant 0 : i32
    %c0_i32_0 = arith.constant 0 : i32
    %c0_i32_1 = arith.constant 0 : i32
    return %c0_i32, %c0_i32_0 : i32, i32
  }
  func.func @transform_2(%arg0: i32) -> (i32, i32) {
    %c0_i32 = arith.constant 0 : i32
    %c0_i32_0 = arith.constant 0 : i32
    %c0_i32_1 = arith.constant 0 : i32
    return %c0_i32, %c0_i32_0 : i32, i32
  }
  func.func @transform_3(%arg0: i32) -> (i32, i32) {
    %c0_i32 = arith.constant 0 : i32
    %c0_i32_0 = arith.constant 0 : i32
    %c0_i32_1 = arith.constant 0 : i32
    return %c0_i32, %c0_i32_0 : i32, i32
  }
  func.func @transform_4(%arg0: i32) -> (i32, i32) {
    %c0_i32 = arith.constant 0 : i32
    %c0_i32_0 = arith.constant 0 : i32
    %c0_i32_1 = arith.constant 0 : i32
    return %c0_i32, %c0_i32_0 : i32, i32
  }
  func.func @transform_5(%arg0: i32) -> (i32, i32) {
    %c0_i32 = arith.constant 0 : i32
    %c0_i32_0 = arith.constant 0 : i32
    %c0_i32_1 = arith.constant 0 : i32
    return %c0_i32, %c0_i32_0 : i32, i32
  }
  func.func @transform_6(%arg0: i32) -> (i32, i32) {
    %c0_i32 = arith.constant 0 : i32
    %c0_i32_0 = arith.constant 0 : i32
    %c0_i32_1 = arith.constant 0 : i32
    return %c0_i32, %c0_i32_0 : i32, i32
  }
  func.func @transform_7(%arg0: i32) -> (i32, i32) {
    %c0_i32 = arith.constant 0 : i32
    %c0_i32_0 = arith.constant 0 : i32
    return %c0_i32, %arg0 : i32, i32
  }
}

</mosaic_0001>

<bundles_post_ra>
// kernel: tpu_custom_call.1
= control target key start
LH: loop header
LB: loop body
LE: loop exit
PB: predicated region body
PF: predicated region fallthrough
CT: control target
= control target key end

     0   :  { %s793_s0 = inlined_call_operand.vmem [shape: bf16[16,8], index: 0, kind: input, shape index: {}]   ;;  %s794_s1 = inlined_call_operand.vmem [shape: bf16[128,16], index: 1, kind: input, shape index: {}]   ;;  %s795_s2 = inlined_call_operand.vmem [shape: f32[128,1], index: 2, kind: input, shape index: {}]   ;;  %s796_s3 = inlined_call_operand.vmem [shape: bf16[32,128], index: 3, kind: input, shape index: {}]   ;;  %s797_s4 = inlined_call_operand.vmem [shape: f32[32,1], index: 4, kind: input, shape index: {}]   ;;  %s798_s5 = inlined_call_operand.vmem [shape: bf16[1,32], index: 5, kind: input, shape index: {}]   ;;  %s799_s6 = inlined_call_operand.<no memory space> [shape: f32[1,1], index: 6, kind: input, shape index: {}]   ;;  %s800_s7 = inlined_call_operand.hbm [shape: f32[1,128], index: 7, kind: output, shape index: {}]  }
   0x1   :  { %v12_v0 = vstv %s799_s6 }
   0x2   :  { %13 = vst [vmem:[#allocation2] sm:$0x1] %v12_v0 }
   0x3   :  { %v595_v1 = vld [vmem:[%s793_s0] sm:$0xff]   ;;  %vm190_vm0 = vcmask 130048   ;;  %v597_v3 = vld [vmem:[%s794_s1 + $0x8] sm:$0xff]   ;;  %v630_v4 = vmov 0   ;;  %v598_v5 = vld [vmem:[%s794_s1 + $0x10] sm:$0xff]  }
   0x4   :  { %v596_v2 = vld [vmem:[%s794_s1] sm:$0xff]   ;;  %543 = vmatprep.subr.bf16.mxu0 %v595_v1  ;;  %593 = vset.pattern.permute.xlu0 %v630_v4  ;;  %v50_v7 = vld [vmem:[%s795_s2 + $0x10] sm:$0xff]  ;;  %v599_v8 = vld [vmem:[%s794_s1 + $0x18] sm:$0xff]  }
   0x5   :  { %544 = vmatpush3.bf16.msra.mxu0 %v595_v1  ;;  %545 = vmatprep.mubr.msk.bf16.mxu0 %vm190_vm0, %v596_v2  ;;  %v48_v6 = vld [vmem:[%s795_s2] sm:$0xff]  ;;  %v49_v10 = vld [vmem:[%s795_s2 + $0x8] sm:$0xff]  ;;  %v51_v11 = vld [vmem:[%s795_s2 + $0x18] sm:$0xff] }
   0x6   :  { %594 = vset.pattern.permute.xlu1 %v630_v4  ;;  %66 = vperm.xlu0 %593, %v48_v6   ;;  %v600_v9 = vld [vmem:[%s794_s1 + $0x20] sm:$0xff]   ;;  %v53_v13 = vld [vmem:[%s795_s2 + $0x28] sm:$0xff] }
   0x7   :  { %76 = vperm.xlu1 %594, %v50_v7   ;;  %v52_v12 = vld [vmem:[%s795_s2 + $0x20] sm:$0xff] }
   0x8   :  { %546 = vmatmul.mubr.msk.bf16.vlgmr.msra.gmra.mrb[0].mxu0 %vm190_vm0, %v597_v3 }
   0x9   :  { %549 = vmatprep.mubr.msk.bf16.mxu0 %vm190_vm0, %v598_v5 }
   0xa   :  { %71 = vperm.xlu0 %593, %v49_v10  }
   0xb   :  { %81 = vperm.xlu1 %594, %v51_v11  }
  0x10   :  { %550 = vmatmul.mubr.msk.bf16.gmra.mrb[4].mxu0 %vm190_vm0, %v599_v8 }
  0x11   :  { %553 = vmatprep.mubr.msk.bf16.mxu0 %vm190_vm0, %v600_v9 }
  0x12   :  { %14 = vsyncpa [#allocation4], 0  ;;  %v601_v14 = vld [vmem:[%s794_s1 + $0x28] sm:$0xff]   ;;  %86 = vperm.xlu0 %593, %v52_v12   ;;  %v602_v15 = vld [vmem:[%s794_s1 + $0x30] sm:$0xff]   ;;  %91 = vperm.xlu1 %594, %v53_v13   ;;  %vm632_vm1 = vmmov 0   ;;  %vm442_vm2 = vcmask 261120  }
  0x13   :  { %v54_v16 = vld [vmem:[%s795_s2 + $0x30] sm:$0xff]  ;;  %v55_v17 = vld [vmem:[%s795_s2 + $0x38] sm:$0xff]  ;;  %v56_v18 = vld [vmem:[%s795_s2 + $0x40] sm:$0xff]  ;;  %s633_s11 = smov [#allocation3]  }
  0x14   :  { %v57_v19 = vld [vmem:[%s795_s2 + $0x48] sm:$0xff]  ;;  %v603_v20 = vld [vmem:[%s794_s1 + $0x38] sm:$0xff]   ;;  %v58_v21 = vld [vmem:[%s795_s2 + $0x50] sm:$0xff]  ;;  %s493_s12 = sshll.u32 %s633_s11, 4  ;;  %s494_s12 = int_to_ptr.vmem [resolvable:$true] %s493_s12 }
  0x15   :  { %v59_v22 = vld [vmem:[%s795_s2 + $0x58] sm:$0xff]  ;;  %v60_v23 = vld [vmem:[%s795_s2 + $0x60] sm:$0xff]  ;;  %v61_v24 = vld [vmem:[%s795_s2 + $0x68] sm:$0xff]  ;;  %s606_s13 = scalar_lea.vmem %s494_s12, 16  ;;  %s610_s14 = scalar_lea.vmem %s494_s12, 32 }
  0x16   :  { %96 = vperm.xlu0 %593, %v54_v16   ;;  %101 = vperm.xlu1 %594, %v55_v17   ;;  %v62_v25 = vld [vmem:[%s795_s2 + $0x70] sm:$0xff]  ;;  %v63_v26 = vld [vmem:[%s795_s2 + $0x78] sm:$0xff]  ;;  %v340_v27 = vld [vmem:[%s797_s4] sm:$0xff]  ;;  %p607_p0 = scmp.ne.s32.totalorder %s494_s12, %s606_s13  ;;  %p611_p1 = scmp.lt.s32.totalorder %s494_s12, %s494_s12 }
  0x17   :  { %v341_v28 = vld [vmem:[%s797_s4 + $0x8] sm:$0xff]  ;;  %v342_v29 = vld [vmem:[%s797_s4 + $0x10] sm:$0xff]  ;;  %v343_v30 = vld [vmem:[%s797_s4 + $0x18] sm:$0xff]  ;;  %p612_p2 = scmp.lt.s32.totalorder %s610_s14, %s606_s13 }
  0x18   :  { %554 = vmatmul.mubr.msk.bf16.gmra.mrb[8].mxu0 %vm190_vm0, %v601_v14  ;;  %v432_v31 = vld [vmem:[#allocation2] sm:$0x1] }
  0x19   :  { %557 = vmatprep.mubr.msk.bf16.mxu0 %vm190_vm0, %v602_v15  ;;  %v604_v32 = vld [vmem:[%s796_s3] sm:$0xff]   ;;  %p613_p3 = por %p612_p2, %p611_p1 }
  0x1a   :  { %106 = vperm.xlu0 %593, %v56_v18   ;;  %111 = vperm.xlu1 %594, %v57_v19  }
  0x1b   :  { %577 = vmatprep.mubr.bf16.mxu1 %v604_v32  ;;  %p614_p4 = pnand %p613_p3, %p607_p0 }
  0x1e   :  { %116 = vperm.xlu0 %593, %v58_v21   ;;  %121 = vperm.xlu1 %594, %v59_v22  }
  0x20   :  { %558 = vmatmul.mubr.msk.bf16.gmra.mrb[12].mxu0 %vm190_vm0, %v603_v20 }
  0x22   :  { %126 = vperm.xlu0 %593, %v60_v23   ;;  %131 = vperm.xlu1 %594, %v61_v24  }
  0x26   :  { %136 = vperm.xlu0 %593, %v62_v25   ;;  %141 = vperm.xlu1 %594, %v63_v26  }
  0x2a   :  { %346 = vperm.xlu0 %593, %v340_v27   ;;  %351 = vperm.xlu1 %594, %v341_v28  }
  0x2e   :  { %356 = vperm.xlu0 %593, %v342_v29   ;;  %361 = vperm.xlu1 %594, %v343_v30  }
  0x32   :  { %435 = vperm.xlu0 %593, %v432_v31  }
  0x85   :  { %v67_v33 = vpop.permute.xlu0 %66 }
  0x86   :  { %v77_v34 = vpop.permute.xlu1 %76 }
  0x89   :  { %v72_v35 = vpop.permute.xlu0 %71 }
  0x8a   :  { %v82_v36 = vpop.permute.xlu1 %81 }
  0x91   :  { %v87_v37 = vpop.permute.xlu0 %86  ;;  %v92_v38 = vpop.permute.xlu1 %91 }
  0x95   :  { %v97_v39 = vpop.permute.xlu0 %96  ;;  %v102_v43 = vpop.permute.xlu1 %101 }
  0x99   :  { %v107_v51 = vpop.permute.xlu0 %106  ;;  %v112_v55 = vpop.permute.xlu1 %111 }
  0x9d   :  { %v117_v0 = vpop.permute.xlu0 %116  ;;  %v122_v4 = vpop.permute.xlu1 %121 }
  0xa1   :  { %v127_v12 = vpop.permute.xlu0 %126  ;;  %v132_v17 = vpop.permute.xlu1 %131 }
  0xa5   :  { %v137_v24 = vpop.permute.xlu0 %136  ;;  %v142_v29 = vpop.permute.xlu1 %141 }
  0xdb   :  { %v547_v40 = vpop.f32.mrb[0].mxu0 }
  0xdc   :  { %v258_v41 = vadd.f32 %v547_v40, %v77_v34  ;;  %v249_v42 = vpop.f32.mrb[1].mxu0 }
  0xdd   :  { %v250_v44 = vadd.f32 %v249_v42, %v67_v33  ;;  %v548_v45 = vpop.f32.mrb[2].mxu0  ;;  %v631_v42 = vmov 0.0  }
  0xde   :  { %v261_v46 = vadd.f32 %v548_v45, %v82_v36  ;;  %v252_v47 = vpop.f32.mrb[3].mxu0  ;;  %v314_v49 = vmax.f32 %v258_v41, 0.0  ;;  %v605_v41 = vld [vmem:[%s796_s3 + $0x8] sm:$0xff]   ;;  %581 = vmatprep.subr.bf16.mxu0 %v631_v42  ;;  %585 = vmatprep.mubr.msk.bf16.mxu0 %vm632_vm1, %v631_v42 }
  0xdf   :  { %v253_v48 = vadd.f32 %v252_v47, %v72_v35  ;;  %v312_v52 = vmax.f32 %v250_v44, 0.0  ;;  %v352_v44 = vpop.permute.xlu1 %351 }
  0xe0   :  { %v315_v50 = vmax.f32 %v261_v46, 0.0 }
  0xe1   :  { %v313_v53 = vmax.f32 %v253_v48, 0.0 }
  0xe2   :  { %v329_v54 = vpack.c.bf16 %v315_v50, %v314_v49 }
  0xe3   :  { %v551_v56 = vpop.f32.mrb[4].mxu0  ;;  %v328_v57 = vpack.c.bf16 %v313_v53, %v312_v52  ;;  %v362_v49 = vpop.permute.xlu1 %361 }
  0xe4   :  { %v274_v58 = vadd.f32 %v551_v56, %v97_v39  ;;  %v265_v59 = vpop.f32.mrb[5].mxu0 }
  0xe5   :  { %v266_v60 = vadd.f32 %v265_v59, %v87_v37  ;;  %v552_v61 = vpop.f32.mrb[6].mxu0  ;;  %561 = vmatprep.subr.bf16.mxu1 %v328_v57 }
  0xe6   :  { %v277_v62 = vadd.f32 %v552_v61, %v102_v43  ;;  %v268_v63 = vpop.f32.mrb[7].mxu0  ;;  %562 = vmatpush3.bf16.msra.mxu1 %v328_v57  ;;  %v318_v2 = vmax.f32 %v274_v58, 0.0  ;;  %v347_v43 = vpop.permute.xlu0 %346  ;;  %v431_v61 = vld [vmem:[%s798_s5] sm:$0x1] }
  0xe7   :  { %v269_v1 = vadd.f32 %v268_v63, %v92_v38  ;;  %563 = vmatprep.subr.bf16.mxu1 %v329_v54  ;;  %v316_v5 = vmax.f32 %v266_v60, 0.0 }
  0xe8   :  { %v319_v3 = vmax.f32 %v277_v62, 0.0  ;;  %v438_v62 = vlaneseq }
  0xe9   :  { %v317_v6 = vmax.f32 %v269_v1, 0.0 }
  0xea   :  { %v331_v7 = vpack.c.bf16 %v319_v3, %v318_v2  ;;  %564 = vmatpush3.bf16.msra.mxu1 %v329_v54  ;;  %v357_v45 = vpop.permute.xlu0 %356  ;;  %v439_v63 = vshrl.u32 %v438_v62, 7 }
  0xeb   :  { %v330_v8 = vpack.c.bf16 %v317_v6, %v316_v5  ;;  %v555_v9 = vpop.f32.mrb[8].mxu0 }
  0xec   :  { %v290_v10 = vadd.f32 %v555_v9, %v117_v0  ;;  %v281_v11 = vpop.f32.mrb[9].mxu0  ;;  %v440_v0 = vsub.s32 0, %v439_v63 }
  0xed   :  { %v282_v13 = vadd.f32 %v281_v11, %v107_v51  ;;  %v556_v14 = vpop.f32.mrb[10].mxu0  ;;  %565 = vmatprep.subr.bf16.mxu1 %v330_v8 }
  0xee   :  { %v293_v15 = vadd.f32 %v556_v14, %v122_v4  ;;  %v284_v16 = vpop.f32.mrb[11].mxu0  ;;  %566 = vmatpush3.bf16.msra.mxu1 %v330_v8  ;;  %v322_v19 = vmax.f32 %v290_v10, 0.0  ;;  %v436_v1 = vpop.permute.xlu0 %435 }
  0xef   :  { %v285_v18 = vadd.f32 %v284_v16, %v112_v55  ;;  %567 = vmatprep.subr.bf16.mxu1 %v331_v7  ;;  %v320_v21 = vmax.f32 %v282_v13, 0.0  ;;  %v441_v2 = vrot.slane %v436_v1, %v440_v0 }
  0xf0   :  { %v323_v20 = vmax.f32 %v293_v15, 0.0 }
  0xf1   :  { %v321_v22 = vmax.f32 %v285_v18, 0.0 }
  0xf2   :  { %v333_v23 = vpack.c.bf16 %v323_v20, %v322_v19  ;;  %568 = vmatpush3.bf16.msra.mxu1 %v331_v7 }
  0xf3   :  { %v332_v25 = vpack.c.bf16 %v321_v22, %v320_v21  ;;  %v559_v26 = vpop.f32.mrb[12].mxu0 }
  0xf4   :  { %v306_v27 = vadd.f32 %v559_v26, %v137_v24  ;;  %v297_v28 = vpop.f32.mrb[13].mxu0 }
  0xf5   :  { %v298_v30 = vadd.f32 %v297_v28, %v127_v12  ;;  %v560_v31 = vpop.f32.mrb[14].mxu0  ;;  %569 = vmatprep.subr.bf16.mxu1 %v332_v25 }
  0xf6   :  { %v309_v32 = vadd.f32 %v560_v31, %v142_v29  ;;  %v300_v33 = vpop.f32.mrb[15].mxu0  ;;  %570 = vmatpush3.bf16.msra.mxu1 %v332_v25  ;;  %v326_v35 = vmax.f32 %v306_v27, 0.0 }
  0xf7   :  { %v301_v34 = vadd.f32 %v300_v33, %v132_v17  ;;  %571 = vmatprep.subr.bf16.mxu1 %v333_v23  ;;  %v324_v37 = vmax.f32 %v298_v30, 0.0 }
  0xf8   :  { %v327_v36 = vmax.f32 %v309_v32, 0.0 }
  0xf9   :  { %v325_v38 = vmax.f32 %v301_v34, 0.0 }
  0xfa   :  { %v335_v39 = vpack.c.bf16 %v327_v36, %v326_v35  ;;  %572 = vmatpush3.bf16.msra.mxu1 %v333_v23 }
  0xfb   :  { %v334_v40 = vpack.c.bf16 %v325_v38, %v324_v37 }
  0xfd   :  { %573 = vmatprep.subr.bf16.mxu1 %v334_v40 }
  0xfe   :  { %574 = vmatpush3.bf16.msra.mxu1 %v334_v40 }
  0xff   :  { %575 = vmatprep.subr.bf16.mxu1 %v335_v39 }
 0x102   :  { %576 = vmatpush3.bf16.msra.mxu1 %v335_v39 }
 0x105   :  { %578 = vmatmul.mubr.bf16.vlgmr.msra.gmra.mrb[0].mxu1 %v605_v41 }
 0x1d8   :  { %v579_v46 = vpop.f32.mrb[0].mxu1 }
 0x1d9   :  { %v419_v47 = vadd.f32 %v579_v46, %v357_v45  ;;  %v410_v48 = vpop.f32.mrb[1].mxu1 }
 0x1da   :  { %v411_v50 = vadd.f32 %v410_v48, %v347_v43  ;;  %v580_v51 = vpop.f32.mrb[2].mxu1 }
 0x1db   :  { %v422_v52 = vadd.f32 %v580_v51, %v362_v49  ;;  %v413_v53 = vpop.f32.mrb[3].mxu1  ;;  %v427_v55 = vmax.f32 %v419_v47, 0.0 }
 0x1dc   :  { %v414_v54 = vadd.f32 %v413_v53, %v352_v44  ;;  %v425_v57 = vmax.f32 %v411_v50, 0.0 }
 0x1dd   :  { %v428_v56 = vmax.f32 %v422_v52, 0.0 }
 0x1de   :  { %v426_v58 = vmax.f32 %v414_v54, 0.0 }
 0x1df   :  { %v430_v59 = vpack.c.bf16 %v428_v56, %v427_v55 }
 0x1e0   :  { %v429_v60 = vpack.c.bf16 %v426_v58, %v425_v57 }
 0x1e2   :  { %582 = vmatpush3.bf16.msra.mxu0 %v429_v60 }
 0x1e3   :  { %583 = vmatprep.subr.bf16.mxu0 %v631_v42 }
 0x1e6   :  { %584 = vmatpush3.bf16.msra.mxu0 %v430_v59 }
 0x1e9   :  { %586 = vmatmul.mubr.msk.bf16.vlgmr.msra.gmra.mrb[16].mxu0 %vm442_vm2, %v431_v61 }
 0x2bc   :  { %v480_v3 = vpop.f32.mrb[16].mxu0 }
 0x2bd   :  { %v481_v4 = vadd.f32 %v480_v3, %v441_v2  ;;  %v587_v5 = vpop.f32.mrb[17].mxu0 }
 0x2be   :  { %v483_v6 = vpop.f32.mrb[18].mxu0 }
 0x2bf   :  { %486 = vst [vmem:[#allocation3] sm:$0x1] %v481_v4  ;;  %v588_v7 = vpop.f32.mrb[19].mxu0 }
 0x2c0   :  { %617 = shalt.err (!%p614_p4)
}
 0x2c1   :  { %s618_s16 = scalar_lea.hbm %s800_s7, 16 }
 0x2c2   :  { %p619_p5 = scmp.ne.s32.totalorder %s800_s7, %s618_s16  ;;  %p622_p6 = scmp.lt.u32.totalorder %s618_s16, %s800_s7 }
 0x2c4   :  { %p624_p7 = pnand %p622_p6, %p619_p5 }
 0x2c6   :  { %627 = shalt.err (!%p624_p7)
}
 0x2c7   :  { %496 = dma.vmem_to_hbm [thread:$0]  %s494_s12, 16, %s800_s7, [#allocation4]  }
 0x2c8   :  { %628 = dma.done.wait [#allocation4], 16  }
 0x2c9   :  { %629 = vsyncadd [#allocation4], 4294967280 }
 0x2ca   :  { %500 = vsyncpa [#allocation4], 1 }

</bundles_post_ra>
